<compile_context>
chip_gen: v5e
topology: v5e:2x2
jax: 0.10.0
libtpu: 0.0.40
codegen_flags: <defaults>
</compile_context>

<pallas_src>
import functools

import jax
import jax.numpy as jnp
from jax import lax
from jax.experimental import pallas as pl
from jax.experimental.pallas import tpu as pltpu

_TEMPERATURE = 0.01


def _round_up(x, m):
    return ((x + m - 1) // m) * m


def _matcher_kernel(src_ref, trg_ref, coords_ref, out_ref, m_sc, acc_sc, *, scale):
    # src_ref    : (TN, C)   source descriptors (pre-transposed), resident over M tiles
    # trg_ref    : (C, TM)   target descriptors for this M tile (zero-padded tail)
    # coords_ref : (3, TM)   [x; y; 1] target coords for this M tile (zero-padded tail)
    # out_ref    : (TN, 2)   pseudo-point coordinates (written at last M tile)
    # m_sc       : (TN, 1)   running row max
    # acc_sc     : (TN, 3)   running [sum p*x, sum p*y, sum p]
    k = pl.program_id(2)

    @pl.when(k == 0)
    def _init():
        m_sc[...] = jnp.full(m_sc.shape, -jnp.inf, dtype=m_sc.dtype)
        acc_sc[...] = jnp.zeros(acc_sc.shape, dtype=acc_sc.dtype)

    # Fold 1/(C*temperature) into the small (TN, C) operand (stays in the input
    # dtype so bf16 descriptors keep the full-rate MXU path). The +1.0 of the
    # reference is a constant logit shift and cancels under softmax.
    src = src_ref[...]
    src = src * jnp.asarray(scale, dtype=src.dtype)
    s = lax.dot_general(src, trg_ref[...],
                        dimension_numbers=(((1,), (0,)), ((), ())),
                        preferred_element_type=jnp.float32)          # (TN, TM)

    # Online softmax update.
    m_prev = m_sc[...]                                               # (TN, 1)
    m_new = jnp.maximum(m_prev, jnp.max(s, axis=-1, keepdims=True))
    alpha = jnp.exp(m_prev - m_new)                                  # (TN, 1)
    p = jnp.exp(s - m_new)                                           # (TN, TM)

    # Fused coordinate + denominator accumulation on the MXU:
    # (TN, TM) x (3, TM)^T -> (TN, 3) = [sum p*x, sum p*y, sum p].
    upd = lax.dot_general(p, coords_ref[...],
                          dimension_numbers=(((1,), (1,)), ((), ())),
                          preferred_element_type=jnp.float32)
    acc_sc[...] = alpha * acc_sc[...] + upd
    m_sc[...] = m_new

    @pl.when(k == pl.num_programs(2) - 1)
    def _finalize():
        acc = acc_sc[...]
        inv_l = 1.0 / acc[:, 2:3]          # exact divide; (TN, 1), once per tile
        out_ref[...] = (acc[:, 0:2] * inv_l).astype(out_ref.dtype)   # single store


def matcher_block(kpt_2D_src, kpt_2D_trg, kpt_desc_norm_src, kpt_desc_norm_trg,
                  *, tn=None, tm=None):
    """Pallas equivalent of MatcherBlock.forward. Returns (B, 2, N) float32."""
    B, _, N = kpt_2D_src.shape
    _, C, _ = kpt_desc_norm_src.shape
    assert kpt_desc_norm_trg.shape[0] == B and kpt_desc_norm_trg.shape[1] == C
    M = kpt_desc_norm_trg.shape[2]
    assert kpt_2D_trg.shape == (B, 2, M)

    # ---- tile selection (arrays are zero-padded to tile multiples) ----------
    # N: sublane dim of src/out blocks -> multiple of 8 is enough.
    nn = pl.cdiv(N, 512) if tn is None else pl.cdiv(N, _round_up(tn, 8))
    tn = _round_up(pl.cdiv(N, nn), 8)
    n_pad = nn * tn
    # M: lane dim of trg/coords blocks -> multiple of 128. Large tiles amortize
    # the per-grid-step overhead and cut desc_trg re-streaming per N tile.
    nm = pl.cdiv(M, 2048) if tm is None else pl.cdiv(M, _round_up(tm, 128))
    tm = _round_up(pl.cdiv(M, nm), 128)
    m_pad = nm * tm

    scale = 1.0 / (float(C) * _TEMPERATURE)      # folds /C and /temperature

    # Source descriptors: (B, N, C), zero-padded over N (padded rows are sliced
    # off the output; they produce finite garbage, never NaN).
    desc_src_t = jnp.swapaxes(kpt_desc_norm_src, 1, 2)
    desc_src_t = jnp.pad(desc_src_t, ((0, 0), (0, n_pad - N), (0, 0)))

    # Target descriptors zero-padded over M: padded columns get logit 0 (finite).
    desc_trg_p = jnp.pad(kpt_desc_norm_trg, ((0, 0), (0, 0), (0, m_pad - M)))

    # coords_ext = [x; y; 1] rows; padded columns are all-zero (incl. the ones
    # row), so they contribute nothing to numerator or denominator.
    ones = jnp.ones((B, 1, M), jnp.float32)
    coords_ext = jnp.concatenate([kpt_2D_trg.astype(jnp.float32), ones], axis=1)
    coords_ext = jnp.pad(coords_ext, ((0, 0), (0, 0), (0, m_pad - M)))

    kernel = functools.partial(_matcher_kernel, scale=scale)

    out_nt2 = pl.pallas_call(
        kernel,
        out_shape=jax.ShapeDtypeStruct((B, n_pad, 2), jnp.float32),
        grid_spec=pltpu.PrefetchScalarGridSpec(
            num_scalar_prefetch=0,
            grid=(B, nn, nm),
            in_specs=[
                pl.BlockSpec((None, tn, C), lambda b, n, k: (b, n, 0)),  # src: resident over M
                pl.BlockSpec((None, C, tm), lambda b, n, k: (b, 0, k)),  # trg: streamed over M
                pl.BlockSpec((None, 3, tm), lambda b, n, k: (b, 0, k)),  # [x;y;1]: streamed
            ],
            out_specs=pl.BlockSpec((None, tn, 2), lambda b, n, k: (b, n, 0)),
            scratch_shapes=[pltpu.VMEM((tn, 1), jnp.float32),
                            pltpu.VMEM((tn, 3), jnp.float32)],
        ),
        compiler_params=pltpu.CompilerParams(
            dimension_semantics=("parallel", "parallel", "arbitrary"),
            vmem_limit_bytes=40 * 1024 * 1024,   # fits v7x's 64 MiB; above defaults elsewhere
        ),
    )(desc_src_t, desc_trg_p, coords_ext)

    return jnp.swapaxes(out_nt2, 1, 2)[:, :, :N]     # (B, 2, N)


def _reference(kpt_2D_src, kpt_2D_trg, kpt_desc_norm_src, kpt_desc_norm_trg):
    """Plain-JAX reference mirroring the PyTorch forward exactly."""
    C = kpt_desc_norm_trg.shape[1]
    match_vals = jnp.einsum("bcn,bcm->bnm",
                            kpt_desc_norm_src.astype(jnp.float32),
                            kpt_desc_norm_trg.astype(jnp.float32)) / float(C)
    match_vals = match_vals + 1.0
    soft = jax.nn.softmax(match_vals / _TEMPERATURE, axis=2)
    return jnp.einsum("bcm,bnm->bcn", kpt_2D_trg.astype(soft.dtype), soft)


def _make_inputs(key, B, C, N, M, desc_dtype=jnp.float32):
    k1, k2, k3, k4 = jax.random.split(key, 4)
    kpt_2D_src = jax.random.uniform(k1, (B, 2, N), jnp.float32) * 16.0
    kpt_2D_trg = jax.random.uniform(k2, (B, 2, M), jnp.float32) * 16.0
    desc_src = jax.random.normal(k3, (B, C, N), jnp.float32)
    desc_trg = jax.random.normal(k4, (B, C, M), jnp.float32)
    # The module expects L2-normalized descriptors (over the channel axis).
    desc_src = desc_src / jnp.linalg.norm(desc_src, axis=1, keepdims=True)
    desc_trg = desc_trg / jnp.linalg.norm(desc_trg, axis=1, keepdims=True)
    return (kpt_2D_src, kpt_2D_trg,
            desc_src.astype(desc_dtype), desc_trg.astype(desc_dtype))


if __name__ == "__main__":
    keys = jax.random.split(jax.random.PRNGKey(0), 4)

    # 1) Small demo (sparse matching): single M tile (M padded 64 -> 128).
    args = _make_inputs(keys[0], B=2, C=32, N=8, M=64)
    out = jax.block_until_ready(matcher_block(*args))
    ref = _reference(*args)
    assert out.shape == (2, 2, 8)
    assert jnp.allclose(out, ref, atol=2e-3, rtol=2e-3), "mismatch (demo shapes)"

    # 2) N and M padding + two M tiles (online softmax across tiles).
    args = _make_inputs(keys[1], B=2, C=32, N=50, M=200)
    out = jax.block_until_ready(matcher_block(*args, tm=128))
    ref = _reference(*args)
    assert jnp.allclose(out, ref, atol=2e-3, rtol=2e-3), "mismatch (padded N/M, M tiles)"

    # 3) N tiling (second parallel grid axis) + three M tiles.
    args = _make_inputs(keys[2], B=1, C=32, N=256, M=384)
    out = jax.block_until_ready(matcher_block(*args, tn=128, tm=128))
    ref = _reference(*args)
    assert jnp.allclose(out, ref, atol=2e-3, rtol=2e-3), "mismatch (N tiles)"

    # 4) bf16 descriptor path (halved HBM stream, full-rate MXU, f32 accumulation).
    args = _make_inputs(keys[3], B=2, C=32, N=8, M=256, desc_dtype=jnp.bfloat16)
    out = jax.block_until_ready(matcher_block(*args, tm=128))
    ref = _reference(args[0], args[1],
                     args[2].astype(jnp.float32), args[3].astype(jnp.float32))
    assert jnp.allclose(out, ref, atol=5e-2, rtol=5e-2), "mismatch (bf16 descriptors)"

    print("KERNEL_OK")
</pallas_src>

<mosaic_0001>
module attributes {stable_mosaic.version = 11 : i64} {
  func.func @_matcher_kernel(%arg0: i32, %arg1: i32, %arg2: i32, %arg3: memref<1x8x32xf32, #tpu.memory_space<vmem>>, %arg4: memref<1x32x128xf32, #tpu.memory_space<vmem>>, %arg5: memref<1x3x128xf32, #tpu.memory_space<vmem>>, %arg6: memref<1x8x2xf32, #tpu.memory_space<vmem>>, %arg7: memref<8x1xf32, #tpu.memory_space<vmem>>, %arg8: memref<8x3xf32, #tpu.memory_space<vmem>>) attributes {dimension_semantics = [#tpu.dimension_semantics<parallel>, #tpu.dimension_semantics<parallel>, #tpu.dimension_semantics<arbitrary>], iteration_bounds = array<i64: 2, 1, 1>, scalar_prefetch = 0 : i64, scratch_operands = 2 : i64, tpu.core_type = #tpu.core_type<tc>, window_params = [{transform_indices = @transform_0, window_bounds = array<i64: 1, 8, 32>}, {transform_indices = @transform_1, window_bounds = array<i64: 1, 32, 128>}, {transform_indices = @transform_2, window_bounds = array<i64: 1, 3, 128>}, {transform_indices = @transform_3, window_bounds = array<i64: 1, 8, 2>}]} {
    %c0_i32 = arith.constant 0 : i32
    %0 = arith.cmpi eq, %arg2, %c0_i32 : i32
    %1 = arith.extui %0 : i1 to i32
    %c0_i32_0 = arith.constant 0 : i32
    %2 = arith.cmpi ne, %1, %c0_i32_0 : i32
    scf.if %2 {
      %cst_22 = arith.constant 0xFF800000 : f32
      %31 = vector.broadcast %cst_22 : f32 to vector<8x1xf32>
      %c0_23 = arith.constant 0 : index
      %c0_24 = arith.constant 0 : index
      %32 = vector.load %arg7[%c0_23, %c0_24] : memref<8x1xf32, #tpu.memory_space<vmem>>, vector<8x1xf32>
      tpu.vector_store %arg7[%c0_23, %c0_24], %31 {strides = array<i32>} : memref<8x1xf32, #tpu.memory_space<vmem>>, vector<8x1xf32>,
      %cst_25 = arith.constant 0.000000e+00 : f32
      %33 = vector.broadcast %cst_25 : f32 to vector<8x3xf32>
      %c0_26 = arith.constant 0 : index
      %c0_27 = arith.constant 0 : index
      %34 = vector.load %arg8[%c0_26, %c0_27] : memref<8x3xf32, #tpu.memory_space<vmem>>, vector<8x3xf32>
      tpu.vector_store %arg8[%c0_26, %c0_27], %33 {strides = array<i32>} : memref<8x3xf32, #tpu.memory_space<vmem>>, vector<8x3xf32>,
    } else {
    }
    %c0 = arith.constant 0 : index
    %c0_1 = arith.constant 0 : index
    %c0_2 = arith.constant 0 : index
    %3 = vector.load %arg3[%c0, %c0_1, %c0_2] : memref<1x8x32xf32, #tpu.memory_space<vmem>>, vector<1x8x32xf32>
    %4 = vector.shape_cast %3 : vector<1x8x32xf32> to vector<8x32xf32>
    %cst = arith.constant 3.125000e+00 : f32
    %5 = vector.broadcast %cst : f32 to vector<8x32xf32>
    %6 = arith.mulf %4, %5 : vector<8x32xf32>
    %c0_3 = arith.constant 0 : index
    %c0_4 = arith.constant 0 : index
    %c0_5 = arith.constant 0 : index
    %7 = vector.load %arg4[%c0_3, %c0_4, %c0_5] : memref<1x32x128xf32, #tpu.memory_space<vmem>>, vector<1x32x128xf32>
    %8 = vector.shape_cast %7 : vector<1x32x128xf32> to vector<32x128xf32>
    %cst_6 = arith.constant dense<0.000000e+00> : vector<8x128xf32>
    %9 = tpu.matmul %6, %8, %cst_6 {dimension_numbers = #tpu.dot_dimension_numbers<[1], [0], [0], [1], [0, 0, 1, 1], [], []>} : vector<8x32xf32>, vector<32x128xf32>, vector<8x128xf32> -> vector<8x128xf32>
    %c0_7 = arith.constant 0 : index
    %c0_8 = arith.constant 0 : index
    %10 = vector.load %arg7[%c0_7, %c0_8] : memref<8x1xf32, #tpu.memory_space<vmem>>, vector<8x1xf32>
    %cst_9 = arith.constant dense<0xFF800000> : vector<8xf32>
    %11 = vector.multi_reduction <maximumf>, %9, %cst_9 [1] : vector<8x128xf32> to vector<8xf32>
    %12 = vector.shape_cast %11 : vector<8xf32> to vector<8x1xf32>
    %13 = arith.maximumf %10, %12 : vector<8x1xf32>
    %14 = arith.subf %10, %13 : vector<8x1xf32>
    %15 = math.exp %14 : vector<8x1xf32>
    %16 = vector.broadcast %13 : vector<8x1xf32> to vector<8x128xf32>
    %17 = arith.subf %9, %16 : vector<8x128xf32>
    %18 = math.exp %17 : vector<8x128xf32>
    %c0_10 = arith.constant 0 : index
    %c0_11 = arith.constant 0 : index
    %c0_12 = arith.constant 0 : index
    %19 = vector.load %arg5[%c0_10, %c0_11, %c0_12] : memref<1x3x128xf32, #tpu.memory_space<vmem>>, vector<1x3x128xf32>
    %20 = vector.shape_cast %19 : vector<1x3x128xf32> to vector<3x128xf32>
    %cst_13 = arith.constant dense<0.000000e+00> : vector<8x3xf32>
    %21 = tpu.matmul %18, %20, %cst_13 {dimension_numbers = #tpu.dot_dimension_numbers<[1], [1], [0], [0], [0, 0, 1, 0], [], []>} : vector<8x128xf32>, vector<3x128xf32>, vector<8x3xf32> -> vector<8x3xf32>
    %c0_14 = arith.constant 0 : index
    %c0_15 = arith.constant 0 : index
    %22 = vector.load %arg8[%c0_14, %c0_15] : memref<8x3xf32, #tpu.memory_space<vmem>>, vector<8x3xf32>
    %23 = vector.broadcast %15 : vector<8x1xf32> to vector<8x3xf32>
    %24 = arith.mulf %23, %22 : vector<8x3xf32>
    %25 = arith.addf %24, %21 : vector<8x3xf32>
    %c0_16 = arith.constant 0 : index
    %c0_17 = arith.constant 0 : index
    %26 = vector.load %arg8[%c0_16, %c0_17] : memref<8x3xf32, #tpu.memory_space<vmem>>, vector<8x3xf32>
    tpu.vector_store %arg8[%c0_16, %c0_17], %25 {strides = array<i32>} : memref<8x3xf32, #tpu.memory_space<vmem>>, vector<8x3xf32>,
    %c0_18 = arith.constant 0 : index
    %c0_19 = arith.constant 0 : index
    %27 = vector.load %arg7[%c0_18, %c0_19] : memref<8x1xf32, #tpu.memory_space<vmem>>, vector<8x1xf32>
    tpu.vector_store %arg7[%c0_18, %c0_19], %13 {strides = array<i32>} : memref<8x1xf32, #tpu.memory_space<vmem>>, vector<8x1xf32>,
    %c0_i32_20 = arith.constant 0 : i32
    %28 = arith.cmpi eq, %arg2, %c0_i32_20 : i32
    %29 = arith.extui %28 : i1 to i32
    %c0_i32_21 = arith.constant 0 : i32
    %30 = arith.cmpi ne, %29, %c0_i32_21 : i32
    scf.if %30 {
      %c0_22 = arith.constant 0 : index
      %c0_23 = arith.constant 0 : index
      %31 = vector.load %arg8[%c0_22, %c0_23] : memref<8x3xf32, #tpu.memory_space<vmem>>, vector<8x3xf32>
      %32 = vector.extract_strided_slice %31 {offsets = [0, 2], sizes = [8, 1], strides = [1, 1]} : vector<8x3xf32> to vector<8x1xf32>
      %cst_24 = arith.constant 1.000000e+00 : f32
      %33 = vector.broadcast %cst_24 : f32 to vector<8x1xf32>
      %34 = arith.divf %33, %32 : vector<8x1xf32>
      %35 = vector.extract_strided_slice %31 {offsets = [0, 0], sizes = [8, 2], strides = [1, 1]} : vector<8x3xf32> to vector<8x2xf32>
      %36 = vector.broadcast %34 : vector<8x1xf32> to vector<8x2xf32>
      %37 = arith.mulf %35, %36 : vector<8x2xf32>
      %c0_25 = arith.constant 0 : index
      %c0_26 = arith.constant 0 : index
      %c0_27 = arith.constant 0 : index
      %38 = vector.load %arg6[%c0_25, %c0_26, %c0_27] : memref<1x8x2xf32, #tpu.memory_space<vmem>>, vector<1x8x2xf32>
      %39 = vector.shape_cast %38 : vector<1x8x2xf32> to vector<8x2xf32>
      %40 = vector.shape_cast %37 : vector<8x2xf32> to vector<1x8x2xf32>
      tpu.vector_store %arg6[%c0_25, %c0_26, %c0_27], %40 {strides = array<i32>} : memref<1x8x2xf32, #tpu.memory_space<vmem>>, vector<1x8x2xf32>,
    } else {
    }
    return
  }
  func.func @transform_0(%arg0: i32, %arg1: i32, %arg2: i32) -> (i32, i32, i32) {
    %c0_i32 = arith.constant 0 : i32
    %c0_i32_0 = arith.constant 0 : i32
    return %arg0, %arg1, %c0_i32 : i32, i32, i32
  }
  func.func @transform_1(%arg0: i32, %arg1: i32, %arg2: i32) -> (i32, i32, i32) {
    %c0_i32 = arith.constant 0 : i32
    %c0_i32_0 = arith.constant 0 : i32
    return %arg0, %c0_i32, %arg2 : i32, i32, i32
  }
  func.func @transform_2(%arg0: i32, %arg1: i32, %arg2: i32) -> (i32, i32, i32) {
    %c0_i32 = arith.constant 0 : i32
    %c0_i32_0 = arith.constant 0 : i32
    return %arg0, %c0_i32, %arg2 : i32, i32, i32
  }
  func.func @transform_3(%arg0: i32, %arg1: i32, %arg2: i32) -> (i32, i32, i32) {
    %c0_i32 = arith.constant 0 : i32
    %c0_i32_0 = arith.constant 0 : i32
    return %arg0, %arg1, %c0_i32 : i32, i32, i32
  }
}

</mosaic_0001>

<bundles_post_ra>
// kernel: tpu_custom_call.1
= control target key start
LH: loop header
LB: loop body
LE: loop exit
PB: predicated region body
PF: predicated region fallthrough
CT: control target
= control target key end

     0   :  { %8 = vsyncpa [#allocation5], 0  ;;  %s886_s0 = inlined_call_operand.hbm [shape: f32[2,8,32], index: 0, kind: input, shape index: {}]   ;;  %s887_s1 = inlined_call_operand.hbm [shape: f32[2,32,128], index: 1, kind: input, shape index: {}]   ;;  %s888_s2 = inlined_call_operand.vmem [shape: f32[2,3,128], index: 2, kind: input, shape index: {}]   ;;  %s889_s3 = inlined_call_operand.vmem [shape: f32[2,8,2], index: 3, kind: output, shape index: {}]  }
   0x1   :  { %10 = vsyncpa [#allocation5 + $0x1], 0 }
   0x2   :  { %11 = vsyncpa [#allocation7], 0 }
   0x3   :  { %13 = vsyncpa [#allocation7 + $0x1], 0  ;;  %s767_s12 = smov 0   ;;  %s769_s13 = smov 0  }
   0x4   :  { %s771_s14 = smov 0   ;;  %s773_s15 = smov 0  }
   0x5   :  { %s775_s16 = smov 0   ;;  %s777_s17 = smov 0  }
   0x6 LB: > { %s531_s18 = sadd.s32 4294967295, %s739_s17   ;;  %s38_s19 = sadd.s32 1, %s735_s16  ;;  %s739_s17 = sphi %s777_s17, %s19_s17   ;;  %s735_s16 = sphi %s775_s16, %s897_s16   ;;  %s731_s15 = sphi %s773_s15, %s896_s15   ;;  %s727_s14 = sphi %s771_s14, %s895_s14   ;;  %s723_s13 = sphi %s769_s13, %s894_s13   ;;  %s719_s12 = sphi %s767_s12, %s893_s12  }
   0x7   : > { %p40_p0 = scmp.ge.s32.totalorder %s38_s19, 2  ;;  %s47_s20 = sadd.s32 1, %s727_s14 }
   0x8   : > { %p54_p1 = scmp.ne.s32.totalorder %s727_s14, %s723_s13  ;;  %p55_p2 = scmp.eq.s32.totalorder %s739_s17, 0 }
   0x9   : > { %s899_s19 = smov (%p40_p0, %s38_s19), 0  ;;  %p60_p4 = scmp.ne.s32.totalorder %s723_s13, %s719_s12 }
   0xa   : > { %p803_p3 = por %p55_p2, %p54_p1  ;;  %s42_s22 = ssub.s32 %s735_s16, %s899_s19 }
   0xb   : > { %p61_p5 = scmp.eq.s32.totalorder %s531_s18, 0  ;;  %p45_p6 = scmp.eq.s32.totalorder %s42_s22, 0 }
   0xc   : > { %p560_p8 = scmp.lt.s32.totalorder %s739_s17, 2  ;;  %s819_s25 = sand.u32 1, %s727_s14  }
   0xd   : > { %p810_p7 = por %p61_p5, %p60_p4  ;;  %s536_s26 = sshll.u32 %s735_s16, 3 }
   0xe   : > { %s816_s24 = scalar_select %p45_p6, %s727_s14, %s47_s20  }
   0xf   : > { %s535_s27 = sshll.u32 %s819_s25, 3  ;;  %s177_s30 = scalar_lea.hbm %s886_s0, %s536_s26 }
  0x10   : > { %s179_s4 = sshll.u32 %s177_s30, 4  ;;  %s172_s5 = scalar_lea.vmem [#allocation4], %s535_s27  ;;  %s180_s4 = int_to_ptr.hbm [resolvable:$true] %s179_s4 }
  0x11   : > { %s181_s6 = sshll.u32 %s172_s5, 4  ;;  %p828_p9 = pnand %p560_p8, %p803_p3  ;;  %s182_s6 = int_to_ptr.vmem [resolvable:$true] %s181_s6 }
  0x12   : > { %p540_p10 = scmp.ge.s32.totalorder %s739_s17, 1  ;;  %p219_p11 = scmp.lt.s32.totalorder %s739_s17, 3 }
  0x13   : > { %s537_s8 = sshll.u32 %s819_s25, 5  ;;  %s169_s9 = scalar_lea.sflag [#allocation5], %s819_s25 }
  0x14   : > { %556 = dma.hbm_to_vmem [thread:$0]  (!%p828_p9), %s180_s4, 128, %s182_s6, %s169_s9  }
  0x15   : > { %p220_p12 = pnand %p540_p10, %p219_p11  ;;  %s548_s10 = sshll.u32 %s735_s16, 5 }
  0x16   : > { %s192_s11 = scalar_lea.vmem [#allocation6], %s537_s8  ;;  %s198_s21 = scalar_lea.hbm %s887_s1, %s548_s10 }
  0x17   : > { %s201_s12 = sshll.u32 %s192_s11, 4  ;;  %s199_s22 = sshll.u32 %s198_s21, 4  ;;  %s202_s12 = int_to_ptr.vmem [resolvable:$true] %s201_s12  ;;  %s200_s22 = int_to_ptr.hbm [resolvable:$true] %s199_s22 }
  0x18   : > { %s189_s26 = scalar_lea.sflag [#allocation7], %s819_s25  ;;  %s741_s27 = smov 128  }
  0x19   : > { %s742_s28 = smov 8   ;;  %223 = sbr.rel (%p220_p12) target bundleno = 683 (0x2ab), region = 32 }
  0x1a   : > { %559 = dma.hbm_to_vmem [thread:$0]  (!%p828_p9), %s200_s22, 512, %s202_s12, %s189_s26, %s741_s27, %s741_s27, %s742_s28  }
  0x1b   : > { %s225_s29 = sand.u32 (!%p220_p12), 1, %s723_s13  }
  0x1c   : > { %s541_s30 = sshll.u32 (!%p220_p12), %s225_s29, 3  ;;  %s226_s4 = scalar_lea.sflag (!%p220_p12), [#allocation5], %s225_s29 }
  0x1d   : > { %s229_s5 = scalar_lea.vmem (!%p220_p12), [#allocation4], %s541_s30 }
  0x1e   : > { %710 = dma.done.wait (%p810_p7), %s226_s4, 128  }
  0x1f   : > { %712 = vsyncadd (%p810_p7), %s226_s4, 4294967168  ;;  %s542_s6 = sshll.u32 %s225_s29, 5  ;;  %s236_s8 = scalar_lea.sflag [#allocation7], %s225_s29 }
  0x20   : > { %s239_s25 = scalar_lea.vmem [#allocation6], %s542_s6 }
  0x21   : > { %714 = dma.done.wait (%p810_p7), %s236_s8, 512  }
  0x22   : > { %716 = vsyncadd (%p810_p7), %s236_s8, 4294966784  ;;  %v304_v0 = vld [vmem:[%s239_s25 + $0x18] sm:$0xff]  ;;  %v303_v1 = vld [vmem:[%s239_s25 + $0x10] sm:$0xff]  ;;  %vm305_vm0 = vcmask 261120   ;;  %vm295_vm1 = vcmask 7168   ;;  %v743_v6 = vmov -inf  }
  0x23   : > { %321 = vmatpush.msra.mxu0 %v304_v0  ;;  %v299_v2 = vld [vmem:[%s229_s5] sm:$0xff]  ;;  %v302_v3 = vld [vmem:[%s239_s25 + $0x8] sm:$0xff]  ;;  %v301_v4 = vld [vmem:[%s239_s25] sm:$0xff]  ;;  %296 = vst.msk [vmem:[#allocation2] sm:$0xff] %vm295_vm1, %v743_v6  ;;  %v744_v8 = vmov 0   ;;  %p277_p13 = scmp.lt.s32.totalorder %s731_s15, 1 }
  0x24   : > { %v300_v5 = vmul.f32 3.125, %v299_v2  ;;  %615 = vset.pattern.permute.xlu0 %v744_v8  ;;  %616 = vset.pattern.permute.xlu1 %v744_v8  ;;  %vm297_vm2 = vcmask 23552   ;;  %v745_v15 = vmov 0.0   ;;  %v746_v21 = vmov 2  }
  0x25   : > { %322 = vmatpush.msra.mxu0 %v303_v1  ;;  %s901_s15 = smov (!%p277_p13, %s731_s15), 1  ;;  %298 = vst.msk [vmem:[#allocation3] sm:$0xff] %vm297_vm2, %v745_v15  ;;  %vm402_vm7 = vcmask 15360  }
  0x26   : > { %s543_s23 = sshll.u32 %s901_s15, 2  ;;  %s544_s11 = sshll.u32 %s901_s15, 3 }
  0x27   : > { %323 = vmatpush.msra.mxu0 %v302_v3  ;;  %s283_s10 = scalar_lea.vmem %s888_s2, %s543_s23  ;;  %s290_s20 = scalar_lea.vmem %s889_s3, %s544_s11 }
  0x28   : > { %v344_v16 = vld [vmem:[%s283_s10] sm:$0x7] }
  0x29   : > { %324 = vmatpush.msra.mxu0 %v301_v4  ;;  %360 = vmatpush.xpose.msra.mxu1 %v344_v16 }
  0x2a   : > { %545 = vmatmul.msk.f32.vlgmr.msra.gmra.mxu0 %vm305_vm0, %v300_v5  ;;  %v329_v9 = vld [vmem:[#allocation2] sm:$0xff] }
  0x2c   : > { %v365_v22 = vld [vmem:[#allocation3] sm:$0xff] }
  0xa7   : > { %v326_v7 = vpop.f32.mrf.mxu0 }
  0xa8   : > { %330 = vmax.xlane.f32.xlu0 %v326_v7 }
 0x11b   : > { %v331_v10 = vpop.xlane.xlu0 %330 }
 0x11c   : > { %v332_v11 = vmax.f32 %v329_v9, %v331_v10 }
 0x11e   : > { %v333_v12 = vsub.f32 %v329_v9, %v332_v11  ;;  %376 = vst.msk [vmem:[#allocation2] sm:$0xff] %vm295_vm1, %v332_v11  ;;  %338 = vperm.xlu0 %615, %v332_v11  }
 0x120   : > { %v334_v13 = vmul.f32 1.442695, %v333_v12 }
 0x122   : > { %619 = vpow2.f32 %v334_v13 }
 0x126   : > { %618 = vset.pattern.permute.xlu0 %v746_v21 }
 0x128   : > { %v620_v14 = vpop.eup %619 }
 0x129   : > { %368 = vperm.xlu1 %616, %v620_v14  }
 0x131   : > { %617 = vset.pattern.permute.xlu1 %v746_v21 }
 0x190   : > { %v339_v17 = vpop.permute.xlu0 %338 }
 0x191   : > { %v341_v18 = vsub.f32 %v326_v7, %v339_v17 }
 0x193   : > { %v342_v19 = vmul.f32 1.442695, %v341_v18 }
 0x195   : > { %621 = vpow2.f32 %v342_v19 }
 0x19b   : > { %v622_v20 = vpop.eup %621  ;;  %v369_v23 = vpop.permute.xlu1 %368 }
 0x19c   : > { %361 = vmatmul.f32.vlgmr.msra.gmra.mxu1 %v622_v20  ;;  %v371_v24 = vmul.f32 %v369_v23, %v365_v22 }
 0x219   : > { %v362_v25 = vpop.f32.mrf.mxu1 }
 0x21a   : > { %v372_v26 = vadd.f32 %v371_v24, %v362_v25 }
 0x21c   : > { %374 = vst.msk [vmem:[#allocation3] sm:$0xff] %vm297_vm2, %v372_v26 }
 0x223   : > { %v380_v27 = vld [vmem:[#allocation3] sm:$0xff] }
 0x224   : > { %623 = vrcp.f32 %v380_v27  ;;  %v392_v31 = vand.u32 2147483648, %v380_v27  ;;  %v390_v33 = vand.u32 2147483647, %v380_v27  ;;  %vm386_vm4 = vweird.f32 %v380_v27 }
 0x226   : > { %v393_v35 = vor.u32 1.1754944e-38, %v392_v31  ;;  %vm391_vm6 = vcmp.eq.f32.partialorder %v390_v33, 8.507059e+37 }
 0x22a   : > { %v624_v28 = vpop.eup %623 }
 0x22b   : > { %v382_v29 = vmul.f32 %v624_v28, %v380_v27  ;;  %vm387_vm3 = vweird.f32 %v624_v28 }
 0x22c   : > { %vm388_vm5 = vmor %vm386_vm4, %vm387_vm3 }
 0x22d   : > { %v383_v30 = vsub.f32 1.0, %v382_v29 }
 0x22f   : > { %v384_v32 = vmul.f32 %v624_v28, %v383_v30 }
 0x231   : > { %v385_v34 = vadd.f32 %v624_v28, %v384_v32 }
 0x233   : > { %v389_v36 = vsel %vm388_vm5, %v624_v28, %v385_v34 }
 0x234   : > { %v394_v37 = vsel %vm391_vm6, %v393_v35, %v389_v36 }
 0x235   : > { %398 = vperm.xlu1 %617, %v394_v37  }
 0x2a7   : > { %v399_v38 = vpop.permute.xlu1 %398 }
 0x2a8   : > { %v401_v39 = vmul.f32 %v399_v38, %v380_v27 }
 0x2aa   : > { %403 = vst.msk [vmem:[%s290_s20] sm:$0xff] %vm402_vm7, %v401_v39 }
 0x2ab PF: > { %s19_s17 = sadd.s32 1, %s739_s17   ;;  %s893_s12 = smov %s723_s13 }
 0x2ac   : > { %p16_p0 = scmp.ge.s32.totalorder %s19_s17, 4   ;;  %s894_s13 = smov %s727_s14 }
 0x2ad   : > { %s895_s14 = smov %s816_s24  ;;  %s896_s15 = smov %s735_s16 }
 0x2ae   : > { %s897_s16 = smov %s899_s19  ;;  %18 = sbr.rel (!%p16_p0) target bundleno = 6 (0x6), region = 96 }
 0x2b3   :  { %429 = vsyncpa [#allocation5], 1 }
 0x2b4   :  { %431 = vsyncpa [#allocation5 + $0x1], 1 }
 0x2b5   :  { %432 = vsyncpa [#allocation7], 1 }
 0x2b6   :  { %434 = vsyncpa [#allocation7 + $0x1], 1 }

</bundles_post_ra>
